<compile_context>
chip_gen: v6e
topology: v6e:2x2x1
jax: 0.10.0
libtpu: 0.0.40
codegen_flags: <defaults>
</compile_context>

<pallas_src>
import functools

import jax
import jax.numpy as jnp
from jax.experimental import pallas as pl
from jax.experimental.pallas import tpu as pltpu


def _round_up(x: int, m: int) -> int:
    return ((x + m - 1) // m) * m


def _disc_zz_kernel(z_ref, rz_ref, w1a_ref, w1b_ref, b1_ref, w2_ref, b2_ref,
                    logits_ref, mid_ref, *, negative_slope):
    # Hoisted bias loads (loaded once per grid step, reused below).
    b1 = b1_ref[...]                                           # (1, OUT_PAD)
    b2 = b2_ref[...]                                           # (1, NC_PAD)

    # fc_1: Linear(2*in_features -> out_features), concat folded into a
    # split matmul:  ZZ @ W1 == Z @ W1[:in] + rec_Z @ W1[in:]
    h = (jnp.dot(z_ref[...], w1a_ref[...],
                 preferred_element_type=jnp.float32)
         + jnp.dot(rz_ref[...], w1b_ref[...],
                   preferred_element_type=jnp.float32)
         + b1)                                                 # (TB, OUT_PAD)

    # LeakyReLU (VPU, f32) ; Dropout(p) in eval mode == identity.
    mid = jnp.where(h >= 0.0, h, negative_slope * h)
    mid_ref[...] = mid.astype(mid_ref.dtype)

    # fc_2: Linear(out_features -> n_classes), lane-padded to NC_PAD.
    logits = jnp.dot(mid, w2_ref[...],
                     preferred_element_type=jnp.float32) + b2  # (TB, NC_PAD)
    logits_ref[...] = logits.astype(logits_ref.dtype)


def discriminator_zz_forward(Z, rec_Z, params, *, negative_slope=0.2):
    """Pallas forward pass. Returns (logits, mid_layer)."""
    B, in_features = Z.shape
    assert rec_Z.shape == (B, in_features)

    w1 = params["w1"]        # (2*in, out)   (pre-transposed vs torch .weight)
    b1 = params["b1"]        # (1, out)
    w2 = params["w2"]        # (out, n_classes)
    b2 = params["b2"]        # (1, n_classes)

    out_features = w1.shape[1]
    n_classes = w2.shape[1]
    # Shape guards: weights must be stored (fan_in, fan_out).
    assert w1.shape == (2 * in_features, out_features), w1.shape
    assert b1.shape == (1, out_features), b1.shape
    assert w2.shape == (out_features, n_classes), w2.shape
    assert b2.shape == (1, n_classes), b2.shape

    # --- Lane-dense padding of the feature axes (weight-side only, zeros). ---
    OUT_PAD = _round_up(out_features, 128)
    NC_PAD = _round_up(n_classes, 128)

    w1p = jnp.pad(w1, ((0, 0), (0, OUT_PAD - out_features)))
    b1p = jnp.pad(b1, ((0, 0), (0, OUT_PAD - out_features)))
    w2p = jnp.pad(w2, ((0, OUT_PAD - out_features), (0, NC_PAD - n_classes)))
    b2p = jnp.pad(b2, ((0, 0), (0, NC_PAD - n_classes)))

    # Split fc_1 weights so the ZZ concat never materializes.
    w1a = w1p[:in_features, :]           # multiplies Z
    w1b = w1p[in_features:, :]           # multiplies rec_Z

    # --- Batch tiling ------------------------------------------------------
    # Pick the largest tile that keeps double-buffered I/O well under the
    # v7x scoped-VMEM budget (~48 MiB), then pad B to a multiple of it.
    VMEM_BUDGET = 48 * 1024 * 1024
    tile_b = min(512, _round_up(B, 8))
    def _tile_bytes(tb):
        per_row = (2 * in_features + OUT_PAD + NC_PAD) * 4
        weights = (2 * in_features * OUT_PAD + OUT_PAD * NC_PAD
                   + OUT_PAD + NC_PAD) * 4
        return 2 * tb * per_row + 2 * weights   # double-buffered
    while tile_b > 8 and _tile_bytes(tile_b) > VMEM_BUDGET:
        tile_b //= 2
    tile_b = max(tile_b, 8)

    B_pad = _round_up(B, tile_b)
    if B_pad != B:
        Z_in = jnp.pad(Z, ((0, B_pad - B), (0, 0)))
        R_in = jnp.pad(rec_Z, ((0, B_pad - B), (0, 0)))
    else:
        Z_in, R_in = Z, rec_Z

    grid = (B_pad // tile_b,)

    kernel = functools.partial(_disc_zz_kernel, negative_slope=negative_slope)

    flops = 2 * B_pad * (2 * in_features * OUT_PAD + OUT_PAD * NC_PAD)
    bytes_accessed = 4 * (
        2 * B_pad * in_features                     # Z, rec_Z reads
        + 2 * in_features * OUT_PAD                 # w1
        + OUT_PAD * NC_PAD + OUT_PAD + NC_PAD       # w2, b1, b2
        + B_pad * (OUT_PAD + NC_PAD))               # mid, logits writes

    logits_p, mid_p = pl.pallas_call(
        kernel,
        out_shape=(
            jax.ShapeDtypeStruct((B_pad, NC_PAD), jnp.float32),
            jax.ShapeDtypeStruct((B_pad, OUT_PAD), jnp.float32),
        ),
        grid=grid,
        in_specs=[
            pl.BlockSpec((tile_b, in_features), lambda i: (i, 0)),   # Z
            pl.BlockSpec((tile_b, in_features), lambda i: (i, 0)),   # rec_Z
            pl.BlockSpec((in_features, OUT_PAD), lambda i: (0, 0)),  # w1a
            pl.BlockSpec((in_features, OUT_PAD), lambda i: (0, 0)),  # w1b
            pl.BlockSpec((1, OUT_PAD), lambda i: (0, 0)),            # b1
            pl.BlockSpec((OUT_PAD, NC_PAD), lambda i: (0, 0)),       # w2
            pl.BlockSpec((1, NC_PAD), lambda i: (0, 0)),             # b2
        ],
        out_specs=(
            pl.BlockSpec((tile_b, NC_PAD), lambda i: (i, 0)),        # logits
            pl.BlockSpec((tile_b, OUT_PAD), lambda i: (i, 0)),       # mid
        ),
        compiler_params=pltpu.CompilerParams(
            dimension_semantics=("parallel",),
            vmem_limit_bytes=VMEM_BUDGET,
        ),
        cost_estimate=pl.CostEstimate(
            flops=flops, transcendentals=0, bytes_accessed=bytes_accessed),
    )(Z_in, R_in, w1a, w1b, b1p, w2p, b2p)

    # Strip the lane / batch padding (zero-cost views inside a jit in the
    # no-padding case).
    logits = logits_p[:B, :n_classes]
    mid = mid_p[:B, :out_features]
    return logits, mid


def init_params(key, in_features, out_features, n_classes):
    """Deterministic synthetic init mirroring nn.Linear shapes
    (weights stored pre-transposed as (fan_in, fan_out))."""
    k1, k2, k3, k4 = jax.random.split(key, 4)
    fan1 = 2 * in_features
    lim1 = 1.0 / jnp.sqrt(fan1)
    lim2 = 1.0 / jnp.sqrt(out_features)
    return {
        "w1": jax.random.uniform(k1, (fan1, out_features), jnp.float32, -lim1, lim1),
        "b1": jax.random.uniform(k2, (1, out_features), jnp.float32, -lim1, lim1),
        "w2": jax.random.uniform(k3, (out_features, n_classes), jnp.float32, -lim2, lim2),
        "b2": jax.random.uniform(k4, (1, n_classes), jnp.float32, -lim2, lim2),
    }


if __name__ == "__main__":
    in_features = 16
    out_features = 32
    n_classes = 1
    batch = 8
    negative_slope = 0.2

    key = jax.random.PRNGKey(0)
    kz, kr, kp = jax.random.split(key, 3)
    Z = jax.random.normal(kz, (batch, in_features), jnp.float32)
    rec_Z = jax.random.normal(kr, (batch, in_features), jnp.float32)
    params = init_params(kp, in_features, out_features, n_classes)

    fwd = jax.jit(functools.partial(discriminator_zz_forward,
                                    negative_slope=negative_slope))
    logits, mid = fwd(Z, rec_Z, params)
    jax.block_until_ready((logits, mid))

    # Pure-JAX reference for sanity.
    ZZ = jnp.concatenate([Z, rec_Z], axis=1)
    h = ZZ @ params["w1"] + params["b1"]
    mid_ref = jnp.where(h >= 0.0, h, negative_slope * h)
    logits_ref = mid_ref @ params["w2"] + params["b2"]

    assert logits.shape == (batch, n_classes)
    assert mid.shape == (batch, out_features)
    assert jnp.allclose(mid, mid_ref, atol=1e-5, rtol=1e-5)
    assert jnp.allclose(logits, logits_ref, atol=1e-5, rtol=1e-5)

    print("KERNEL_OK")
</pallas_src>

<mosaic_0001>
module attributes {stable_mosaic.version = 11 : i64} {
  func.func @_disc_zz_kernel(%arg0: i32, %arg1: memref<8x16xf32, #tpu.memory_space<vmem>>, %arg2: memref<8x16xf32, #tpu.memory_space<vmem>>, %arg3: memref<16x128xf32, #tpu.memory_space<vmem>>, %arg4: memref<16x128xf32, #tpu.memory_space<vmem>>, %arg5: memref<1x128xf32, #tpu.memory_space<vmem>>, %arg6: memref<128x128xf32, #tpu.memory_space<vmem>>, %arg7: memref<1x128xf32, #tpu.memory_space<vmem>>, %arg8: memref<8x128xf32, #tpu.memory_space<vmem>>, %arg9: memref<8x128xf32, #tpu.memory_space<vmem>>) attributes {dimension_semantics = [#tpu.dimension_semantics<parallel>], iteration_bounds = array<i64: 1>, scalar_prefetch = 0 : i64, scratch_operands = 0 : i64, tpu.core_type = #tpu.core_type<tc>, window_params = [{transform_indices = @transform_0, window_bounds = array<i64: 8, 16>}, {transform_indices = @transform_1, window_bounds = array<i64: 8, 16>}, {pipeline_mode = #tpu.pipeline_mode<synchronous>, transform_indices = @transform_2, window_bounds = array<i64: 16, 128>}, {pipeline_mode = #tpu.pipeline_mode<synchronous>, transform_indices = @transform_3, window_bounds = array<i64: 16, 128>}, {pipeline_mode = #tpu.pipeline_mode<synchronous>, transform_indices = @transform_4, window_bounds = array<i64: 1, 128>}, {pipeline_mode = #tpu.pipeline_mode<synchronous>, transform_indices = @transform_5, window_bounds = array<i64: 128, 128>}, {pipeline_mode = #tpu.pipeline_mode<synchronous>, transform_indices = @transform_6, window_bounds = array<i64: 1, 128>}, {transform_indices = @transform_7, window_bounds = array<i64: 8, 128>}, {transform_indices = @transform_8, window_bounds = array<i64: 8, 128>}]} {
    %c0 = arith.constant 0 : index
    %c0_0 = arith.constant 0 : index
    %0 = vector.load %arg5[%c0, %c0_0] : memref<1x128xf32, #tpu.memory_space<vmem>>, vector<1x128xf32>
    %c0_1 = arith.constant 0 : index
    %c0_2 = arith.constant 0 : index
    %1 = vector.load %arg7[%c0_1, %c0_2] : memref<1x128xf32, #tpu.memory_space<vmem>>, vector<1x128xf32>
    %c0_3 = arith.constant 0 : index
    %c0_4 = arith.constant 0 : index
    %2 = vector.load %arg1[%c0_3, %c0_4] : memref<8x16xf32, #tpu.memory_space<vmem>>, vector<8x16xf32>
    %c0_5 = arith.constant 0 : index
    %c0_6 = arith.constant 0 : index
    %3 = vector.load %arg3[%c0_5, %c0_6] : memref<16x128xf32, #tpu.memory_space<vmem>>, vector<16x128xf32>
    %cst = arith.constant dense<0.000000e+00> : vector<8x128xf32>
    %4 = tpu.matmul %2, %3, %cst {dimension_numbers = #tpu.dot_dimension_numbers<[1], [0], [0], [1], [0, 0, 1, 1], [], []>} : vector<8x16xf32>, vector<16x128xf32>, vector<8x128xf32> -> vector<8x128xf32>
    %c0_7 = arith.constant 0 : index
    %c0_8 = arith.constant 0 : index
    %5 = vector.load %arg2[%c0_7, %c0_8] : memref<8x16xf32, #tpu.memory_space<vmem>>, vector<8x16xf32>
    %c0_9 = arith.constant 0 : index
    %c0_10 = arith.constant 0 : index
    %6 = vector.load %arg4[%c0_9, %c0_10] : memref<16x128xf32, #tpu.memory_space<vmem>>, vector<16x128xf32>
    %cst_11 = arith.constant dense<0.000000e+00> : vector<8x128xf32>
    %7 = tpu.matmul %5, %6, %cst_11 {dimension_numbers = #tpu.dot_dimension_numbers<[1], [0], [0], [1], [0, 0, 1, 1], [], []>} : vector<8x16xf32>, vector<16x128xf32>, vector<8x128xf32> -> vector<8x128xf32>
    %8 = arith.addf %4, %7 : vector<8x128xf32>
    %9 = vector.broadcast %0 : vector<1x128xf32> to vector<8x128xf32>
    %10 = arith.addf %8, %9 : vector<8x128xf32>
    %cst_12 = arith.constant 0.000000e+00 : f32
    %11 = vector.broadcast %cst_12 : f32 to vector<8x128xf32>
    %12 = arith.cmpf oge, %10, %11 : vector<8x128xf32>
    %cst_13 = arith.constant 2.000000e-01 : f32
    %13 = vector.broadcast %cst_13 : f32 to vector<8x128xf32>
    %14 = arith.mulf %13, %10 : vector<8x128xf32>
    %15 = arith.select %12, %10, %14 : vector<8x128xi1>, vector<8x128xf32>
    %c0_14 = arith.constant 0 : index
    %c0_15 = arith.constant 0 : index
    %16 = vector.load %arg9[%c0_14, %c0_15] : memref<8x128xf32, #tpu.memory_space<vmem>>, vector<8x128xf32>
    tpu.vector_store %arg9[%c0_14, %c0_15], %15 {strides = array<i32>} : memref<8x128xf32, #tpu.memory_space<vmem>>, vector<8x128xf32>,
    %c0_16 = arith.constant 0 : index
    %c0_17 = arith.constant 0 : index
    %17 = vector.load %arg6[%c0_16, %c0_17] : memref<128x128xf32, #tpu.memory_space<vmem>>, vector<128x128xf32>
    %cst_18 = arith.constant dense<0.000000e+00> : vector<8x128xf32>
    %18 = tpu.matmul %15, %17, %cst_18 {dimension_numbers = #tpu.dot_dimension_numbers<[1], [0], [0], [1], [0, 0, 1, 1], [], []>} : vector<8x128xf32>, vector<128x128xf32>, vector<8x128xf32> -> vector<8x128xf32>
    %19 = vector.broadcast %1 : vector<1x128xf32> to vector<8x128xf32>
    %20 = arith.addf %18, %19 : vector<8x128xf32>
    %c0_19 = arith.constant 0 : index
    %c0_20 = arith.constant 0 : index
    %21 = vector.load %arg8[%c0_19, %c0_20] : memref<8x128xf32, #tpu.memory_space<vmem>>, vector<8x128xf32>
    tpu.vector_store %arg8[%c0_19, %c0_20], %20 {strides = array<i32>} : memref<8x128xf32, #tpu.memory_space<vmem>>, vector<8x128xf32>,
    return
  }
  func.func @transform_0(%arg0: i32) -> (i32, i32) {
    %c0_i32 = arith.constant 0 : i32
    %c0_i32_0 = arith.constant 0 : i32
    return %arg0, %c0_i32 : i32, i32
  }
  func.func @transform_1(%arg0: i32) -> (i32, i32) {
    %c0_i32 = arith.constant 0 : i32
    %c0_i32_0 = arith.constant 0 : i32
    return %arg0, %c0_i32 : i32, i32
  }
  func.func @transform_2(%arg0: i32) -> (i32, i32) {
    %c0_i32 = arith.constant 0 : i32
    %c0_i32_0 = arith.constant 0 : i32
    %c0_i32_1 = arith.constant 0 : i32
    return %c0_i32, %c0_i32_0 : i32, i32
  }
  func.func @transform_3(%arg0: i32) -> (i32, i32) {
    %c0_i32 = arith.constant 0 : i32
    %c0_i32_0 = arith.constant 0 : i32
    %c0_i32_1 = arith.constant 0 : i32
    return %c0_i32, %c0_i32_0 : i32, i32
  }
  func.func @transform_4(%arg0: i32) -> (i32, i32) {
    %c0_i32 = arith.constant 0 : i32
    %c0_i32_0 = arith.constant 0 : i32
    %c0_i32_1 = arith.constant 0 : i32
    return %c0_i32, %c0_i32_0 : i32, i32
  }
  func.func @transform_5(%arg0: i32) -> (i32, i32) {
    %c0_i32 = arith.constant 0 : i32
    %c0_i32_0 = arith.constant 0 : i32
    %c0_i32_1 = arith.constant 0 : i32
    return %c0_i32, %c0_i32_0 : i32, i32
  }
  func.func @transform_6(%arg0: i32) -> (i32, i32) {
    %c0_i32 = arith.constant 0 : i32
    %c0_i32_0 = arith.constant 0 : i32
    %c0_i32_1 = arith.constant 0 : i32
    return %c0_i32, %c0_i32_0 : i32, i32
  }
  func.func @transform_7(%arg0: i32) -> (i32, i32) {
    %c0_i32 = arith.constant 0 : i32
    %c0_i32_0 = arith.constant 0 : i32
    return %arg0, %c0_i32 : i32, i32
  }
  func.func @transform_8(%arg0: i32) -> (i32, i32) {
    %c0_i32 = arith.constant 0 : i32
    %c0_i32_0 = arith.constant 0 : i32
    return %arg0, %c0_i32 : i32, i32
  }
}

</mosaic_0001>

<bundles_post_ra>
// kernel: discriminator_zz_forward.1
= control target key start
LH: loop header
LB: loop body
LE: loop exit
PB: predicated region body
PF: predicated region fallthrough
CT: control target
= control target key end

     0   :  { %v407_v1 = vmov 0.0   ;;  %vm408_vm0 = vmmov 0   ;;  %vm37_vm1 = vcmask 130048   ;;  %s561_s0 = inlined_call_operand.vmem [shape: f32[8,16], index: 0, kind: input, shape index: {}]   ;;  %s562_s1 = inlined_call_operand.vmem [shape: f32[8,16], index: 1, kind: input, shape index: {}]   ;;  %s563_s2 = inlined_call_operand.vmem [shape: f32[16,128], index: 2, kind: input, shape index: {}]   ;;  %s564_s3 = inlined_call_operand.vmem [shape: f32[16,128], index: 3, kind: input, shape index: {}]   ;;  %s565_s4 = inlined_call_operand.vmem [shape: f32[1,128], index: 4, kind: input, shape index: {}]   ;;  %s566_s5 = inlined_call_operand.vmem [shape: f32[128,128], index: 5, kind: input, shape index: {}]   ;;  %s567_s6 = inlined_call_operand.vmem [shape: f32[1,128], index: 6, kind: input, shape index: {}]   ;;  %s568_s7 = inlined_call_operand.vmem [shape: f32[8,128], index: 7, kind: output, shape index: {0}]   ;;  %s569_s8 = inlined_call_operand.hbm [shape: f32[8,128], index: 8, kind: output, shape index: {1}]  }
   0x1   :  { %v36_v0 = vld [vmem:[%s564_s3 + $0x8] sm:$0xff]  ;;  %333 = vmatprep.subr.mxu1 %v407_v1  ;;  %v35_v2 = vld [vmem:[%s564_s3] sm:$0xff]  ;;  %337 = vmatprep.mubr.msk.f32.mxu1 %vm408_vm0, %v407_v1  ;;  %v210_v4 = vld [vmem:[%s566_s5 + $0x78] sm:$0xff] }
   0x2   :  { %334 = vmatpush3.msra.mxu1 %v36_v0  ;;  %v34_v3 = vld [vmem:[%s562_s1] sm:$0xff]  ;;  %347 = vmatprep.subr.mxu0 %v407_v1  ;;  %v33_v5 = vld [vmem:[%s563_s2 + $0x8] sm:$0xff]  ;;  %v209_v6 = vld [vmem:[%s566_s5 + $0x70] sm:$0xff] }
   0x3   :  { %335 = vmatprep.subr.mxu1 %v407_v1  ;;  %348 = vmatpush3.msra.mxu0 %v210_v4  ;;  %v32_v7 = vld [vmem:[%s563_s2] sm:$0xff] }
   0x4   :  { %336 = vmatpush3.msra.mxu1 %v35_v2  ;;  %349 = vmatprep.subr.mxu0 %v407_v1 }
   0x5   :  { %338 = vmatmul.mubr.msk.f32.vlgmr.msra.gmra.mxu1 %vm37_vm1, %v34_v3  ;;  %340 = vmatprep.subr.mxu1 %v407_v1 }
   0x6   :  { %14 = vsyncpa [#allocation3], 0  ;;  %341 = vmatpush3.msra.mxu1 %v33_v5  ;;  %344 = vmatprep.mubr.msk.f32.mxu1 %vm408_vm0, %v407_v1  ;;  %v31_v8 = vld [vmem:[%s561_s0] sm:$0xff]  ;;  %v208_v9 = vld [vmem:[%s566_s5 + $0x68] sm:$0xff] }
   0x7   :  { %342 = vmatprep.subr.mxu1 %v407_v1  ;;  %350 = vmatpush3.msra.mxu0 %v209_v6  ;;  %v207_v10 = vld [vmem:[%s566_s5 + $0x60] sm:$0xff]  ;;  %v206_v11 = vld [vmem:[%s566_s5 + $0x58] sm:$0xff]  ;;  %v205_v12 = vld [vmem:[%s566_s5 + $0x50] sm:$0xff] }
   0x8   :  { %343 = vmatpush3.msra.mxu1 %v32_v7  ;;  %351 = vmatprep.subr.mxu0 %v407_v1  ;;  %v204_v13 = vld [vmem:[%s566_s5 + $0x48] sm:$0xff]  ;;  %v203_v14 = vld [vmem:[%s566_s5 + $0x40] sm:$0xff]  ;;  %v202_v15 = vld [vmem:[%s566_s5 + $0x38] sm:$0xff] }
   0x9   :  { %345 = vmatmul.mubr.msk.f32.vlgmr.msra.gmra.mxu1 %vm37_vm1, %v31_v8  ;;  %352 = vmatpush3.msra.mxu0 %v208_v9  ;;  %v201_v16 = vld [vmem:[%s566_s5 + $0x30] sm:$0xff]  ;;  %v200_v17 = vld [vmem:[%s566_s5 + $0x28] sm:$0xff]  ;;  %v199_v18 = vld [vmem:[%s566_s5 + $0x20] sm:$0xff] }
   0xa   :  { %353 = vmatprep.subr.mxu0 %v407_v1  ;;  %379 = vmatprep.mubr.msk.f32.mxu0 %vm408_vm0, %v407_v1  ;;  %v198_v19 = vld [vmem:[%s566_s5 + $0x18] sm:$0xff]  ;;  %v197_v20 = vld [vmem:[%s566_s5 + $0x10] sm:$0xff]  ;;  %v196_v21 = vld [vmem:[%s566_s5 + $0x8] sm:$0xff] }
   0xb   :  { %354 = vmatpush3.msra.mxu0 %v207_v10  ;;  %v195_v22 = vld [vmem:[%s566_s5] sm:$0xff]  ;;  %s409_s5 = smov [#allocation2]  }
   0xc   :  { %355 = vmatprep.subr.mxu0 %v407_v1  ;;  %v308_v25 = vld [vmem:[%s565_s4] ss:$0 sm:$0xff]  ;;  %s296_s0 = sshll.u32 %s409_s5, 4  ;;  %s297_s0 = int_to_ptr.vmem [resolvable:$true] %s296_s0 }
   0xd   :  { %356 = vmatpush3.msra.mxu0 %v206_v11  ;;  %s385_s22 = scalar_lea.vmem %s297_s0, 128  ;;  %p390_p1 = scmp.lt.s32.totalorder %s297_s0, %s297_s0 }
   0xe   :  { %357 = vmatprep.subr.mxu0 %v407_v1  ;;  %p386_p0 = scmp.ne.s32.totalorder %s297_s0, %s385_s22  ;;  %p391_p2 = scmp.lt.s32.totalorder %s385_s22, %s385_s22 }
   0xf   :  { %358 = vmatpush3.msra.mxu0 %v205_v12 }
  0x10   :  { %359 = vmatprep.subr.mxu0 %v407_v1  ;;  %p392_p3 = por %p391_p2, %p390_p1 }
  0x11   :  { %360 = vmatpush3.msra.mxu0 %v204_v13 }
  0x12   :  { %361 = vmatprep.subr.mxu0 %v407_v1  ;;  %p393_p4 = pnand %p392_p3, %p386_p0 }
  0x13   :  { %362 = vmatpush3.msra.mxu0 %v203_v14 }
  0x14   :  { %363 = vmatprep.subr.mxu0 %v407_v1 }
  0x15   :  { %364 = vmatpush3.msra.mxu0 %v202_v15 }
  0x16   :  { %365 = vmatprep.subr.mxu0 %v407_v1 }
  0x17   :  { %366 = vmatpush3.msra.mxu0 %v201_v16 }
  0x18   :  { %367 = vmatprep.subr.mxu0 %v407_v1 }
  0x19   :  { %368 = vmatpush3.msra.mxu0 %v200_v17 }
  0x1a   :  { %369 = vmatprep.subr.mxu0 %v407_v1 }
  0x1b   :  { %370 = vmatpush3.msra.mxu0 %v199_v18 }
  0x1c   :  { %371 = vmatprep.subr.mxu0 %v407_v1 }
  0x1d   :  { %372 = vmatpush3.msra.mxu0 %v198_v19 }
  0x1e   :  { %373 = vmatprep.subr.mxu0 %v407_v1 }
  0x1f   :  { %374 = vmatpush3.msra.mxu0 %v197_v20 }
  0x20   :  { %375 = vmatprep.subr.mxu0 %v407_v1 }
  0x21   :  { %376 = vmatpush3.msra.mxu0 %v196_v21 }
  0x22   :  { %377 = vmatprep.subr.mxu0 %v407_v1 }
  0x23   :  { %378 = vmatpush3.msra.mxu0 %v195_v22 }
  0xc5   :  { %v107_v23 = vpop.f32.mrf.mxu1 }
  0xc7   :  { %v339_v24 = vpop.f32.mrf.mxu1 }
  0xc9   :  { %v180_v26 = vpop.f32.mrf.mxu1 }
  0xca   :  { %v181_v27 = vadd.f32 %v180_v26, %v107_v23 }
  0xcb   :  { %v346_v28 = vpop.f32.mrf.mxu1 }
  0xcc   :  { %v190_v29 = vadd.f32 %v308_v25, %v181_v27 }
  0xce   :  { %vm191_vm2 = vcmp.ge.f32.partialorder %v190_v29, 0.0  ;;  %v192_v30 = vmul.f32 0.2, %v190_v29 }
  0xd0   :  { %v193_v31 = vsel %vm191_vm2, %v190_v29, %v192_v30 }
  0xd1   :  { %380 = vmatmul.mubr.f32.vlgmr.msra.gmra.mxu0 %v193_v31  ;;  %194 = vst [vmem:[#allocation2] sm:$0xff] %v193_v31 }
  0xd2   :  { %396 = shalt.err (!%p393_p4)
}
  0xd3   :  { %299 = dma.vmem_to_hbm [thread:$0]  %s297_s0, 128, %s569_s8, [#allocation3]   ;;  %v309_v32 = vld [vmem:[%s567_s6] ss:$0 sm:$0xff] }
 0x191   :  { %v283_v33 = vpop.f32.mrf.mxu0 }
 0x192   :  { %v284_v34 = vadd.f32 %v309_v32, %v283_v33 }
 0x193   :  { %v381_v35 = vpop.f32.mrf.mxu0 }
 0x194   :  { %287 = vst [vmem:[%s568_s7] sm:$0xff] %v284_v34 }
 0x195   :  { %405 = dma.done.wait [#allocation3], 128  }
 0x196   :  { %406 = vsyncadd [#allocation3], 4294967168 }
 0x197   :  { %305 = vsyncpa [#allocation3], 1 }

</bundles_post_ra>
